<compile_context>
chip_gen: v6e
topology: v6e:2x2x1
jax: 0.10.0
libtpu: 0.0.40
codegen_flags: <defaults>
</compile_context>

<pallas_src>
import jax
import jax.numpy as jnp
from jax import lax
from jax.experimental import pallas as pl
from jax.experimental.pallas import tpu as pltpu

BN_EPS = 1e-5
LANE = 128  # TODO(synk): use 256-granule hidden padding on v6e/v7x MXUs.


# ---------------------------------------------------------------------------
# helpers
# ---------------------------------------------------------------------------
def _round_up(n, m):
    return ((n + m - 1) // m) * m


def _pad2d(a, rows, cols, val=0.0):
    r, c = a.shape
    if r == rows and c == cols:
        return a
    return jnp.pad(a, ((0, rows - r), (0, cols - c)), constant_values=val)


def _vmem_spec():
    return pl.BlockSpec(memory_space=pltpu.VMEM)


# ---------------------------------------------------------------------------
# Pallas kernels
# ---------------------------------------------------------------------------
def _make_fused_mlp_kernel(num_hidden, has_mid):
    """Fused kernel: num_hidden x (matmul + BN(train) + relu) + final matmul+bias.

    Ref layout (has_mid=True):
      x, w0, w_mid(HBM), gammas, betas, w_out, b_out | out | wbuf, sem
    Ref layout (has_mid=False):
      x, w0, gammas, betas, w_out, b_out | out
    Static Python loop over layers -> the running activation never leaves
    VMEM/vregs; hidden->hidden weights are double-buffered HBM->VMEM.
    """

    def kernel(*refs):
        if has_mid:
            (x_ref, w0_ref, wmid_hbm, gamma_ref, beta_ref,
             wout_ref, bout_ref, o_ref, wbuf, sem) = refs
        else:
            (x_ref, w0_ref, gamma_ref, beta_ref,
             wout_ref, bout_ref, o_ref) = refs
            wmid_hbm = wbuf = sem = None

        copies = {}

        def start_fetch(layer):  # prefetch hidden layer `layer`'s weight slab
            slot = (layer - 1) & 1
            cp = pltpu.make_async_copy(
                wmid_hbm.at[layer - 1], wbuf.at[slot], sem.at[slot])
            cp.start()
            copies[layer] = cp

        if has_mid:
            start_fetch(1)  # overlaps with layer-0 matmul + BN below

        h = x_ref[...].astype(jnp.float32)
        for layer in range(num_hidden):
            if layer == 0:
                w = w0_ref[...]
            else:
                copies[layer].wait()
                if layer + 1 < num_hidden:
                    start_fetch(layer + 1)       # hide next layer's DMA
                w = wbuf[(layer - 1) & 1]

            # z = h @ W on the MXU (bf16 operands, f32 accumulate).
            # Hidden pre-BN bias dropped: it cancels exactly in (z - mean).
            z = jnp.dot(h.astype(jnp.bfloat16), w,
                        preferred_element_type=jnp.float32)

            # BatchNorm1d (training mode, batch stats), two-pass variance, f32.
            # TODO(synk): for large N compute sum / sum-of-squares via an MXU
            #   ones-row matmul instead of the XLU axis=0 reduction.
            mean = jnp.mean(z, axis=0, keepdims=True)
            zc = z - mean
            var = jnp.mean(zc * zc, axis=0, keepdims=True)
            scale = gamma_ref[layer:layer + 1, :] * lax.rsqrt(var + BN_EPS)
            h = jnp.maximum(zc * scale + beta_ref[layer:layer + 1, :], 0.0)

        z = jnp.dot(h.astype(jnp.bfloat16), wout_ref[...],
                    preferred_element_type=jnp.float32) + bout_ref[...]
        o_ref[...] = z.astype(o_ref.dtype)

    return kernel


def _linear_kernel(x_ref, w_ref, b_ref, o_ref):
    z = jnp.dot(x_ref[...].astype(jnp.bfloat16), w_ref[...],
                preferred_element_type=jnp.float32)
    o_ref[...] = (z + b_ref[...]).astype(o_ref.dtype)


# ---------------------------------------------------------------------------
# pallas_call wrappers (single launch; no grid: everything fits in VMEM)
# ---------------------------------------------------------------------------
def fused_mlp_forward(x, w0, w_mid, gammas, betas, w_out, b_out):
    n = x.shape[0]
    out_dim = w_out.shape[1]
    hid_pad = w0.shape[1]
    num_hidden = gammas.shape[0]
    has_mid = w_mid is not None

    inputs = [x, w0] + ([w_mid] if has_mid else []) + [gammas, betas, w_out, b_out]
    in_specs = ([_vmem_spec(), _vmem_spec()]
                + ([pl.BlockSpec(memory_space=pl.ANY)] if has_mid else [])
                + [_vmem_spec()] * 4)

    scratch_shapes = []
    if has_mid:
        scratch_shapes = [pltpu.VMEM((2, hid_pad, hid_pad), w_mid.dtype),
                          pltpu.SemaphoreType.DMA((2,))]

    # Explicit scoped-VMEM budget sized from the actual resident set (v5e's
    # default scoped limit is only 16 MiB).
    est = sum(int(a.size) * a.dtype.itemsize for a in inputs)
    est += n * out_dim * 4                 # output tile
    est += 4 * n * hid_pad * 4             # live activations (h, z, zc, ...)
    if has_mid:
        est += 2 * hid_pad * hid_pad * 2   # double-buffered weight slab
    vmem_limit = int(min(64 << 20, max(16 << 20, 4 * est)))

    return pl.pallas_call(
        _make_fused_mlp_kernel(num_hidden, has_mid),
        out_shape=jax.ShapeDtypeStruct((n, out_dim), jnp.float32),
        in_specs=in_specs,
        out_specs=_vmem_spec(),
        scratch_shapes=scratch_shapes,
        compiler_params=pltpu.CompilerParams(vmem_limit_bytes=vmem_limit),
    )(*inputs)


def linear_forward(x, w, b):
    n = x.shape[0]
    out_dim = w.shape[1]
    return pl.pallas_call(
        _linear_kernel,
        out_shape=jax.ShapeDtypeStruct((n, out_dim), jnp.float32),
        in_specs=[_vmem_spec()] * 3,
        out_specs=_vmem_spec(),
        compiler_params=pltpu.CompilerParams(vmem_limit_bytes=32 << 20),
    )(x, w, b)


# ---------------------------------------------------------------------------
# MLP module (param setup in plain JAX, hot path = one Pallas kernel)
# ---------------------------------------------------------------------------
class MLP:
    def __init__(self, num_layers, input_dim, hidden_dim, output_dim, key):
        if num_layers < 1:
            raise ValueError("Number of MLP layers MUST be positive!")
        self.num_layers = num_layers
        self.linear_or_not = num_layers == 1
        self.input_dim = input_dim
        self.hidden_dim = hidden_dim
        self.output_dim = output_dim

        dims = ([input_dim, output_dim] if self.linear_or_not
                else [input_dim] + [hidden_dim] * (num_layers - 1) + [output_dim])

        # Master f32 params (PyTorch-equivalent init); used by the references.
        self.weights, self.biases = [], []
        for i in range(len(dims) - 1):
            fan_in, fan_out = dims[i], dims[i + 1]
            key, wk, bk = jax.random.split(key, 3)
            bound = 1.0 / float(fan_in) ** 0.5
            w = jax.random.uniform(wk, (fan_in, fan_out), jnp.float32, -bound, bound)
            b = jax.random.uniform(bk, (1, fan_out), jnp.float32, -bound, bound)
            self.weights.append(w)
            self.biases.append(b)

        n_bn = 0 if self.linear_or_not else num_layers - 1
        self.gammas = [jnp.ones((1, hidden_dim), jnp.float32) for _ in range(n_bn)]
        self.betas = [jnp.zeros((1, hidden_dim), jnp.float32) for _ in range(n_bn)]

        # bf16 matmul weights (MXU-native on v5e/v6e/v7x).
        self.w_bf16 = [w.astype(jnp.bfloat16) for w in self.weights]

        if self.linear_or_not:
            self._w0 = self.w_bf16[0]           # (input_dim, output_dim) bf16
            self._b0 = self.biases[0]
            return

        # Hidden dims padded to the 128-lane width; K dim of the first layer
        # and the output width of the last layer stay at their true sizes
        # (zero-padded rows/cols are exact no-ops through matmul/BN/relu).
        hid_pad = _round_up(hidden_dim, LANE)
        self._hid_pad = hid_pad
        num_hidden = num_layers - 1

        self._w0 = _pad2d(self.w_bf16[0], input_dim, hid_pad)
        n_mid = num_layers - 2
        if n_mid > 0:
            self._w_mid = jnp.stack(
                [_pad2d(self.w_bf16[1 + i], hid_pad, hid_pad) for i in range(n_mid)])
        else:
            self._w_mid = None
        self._gammas = jnp.stack(
            [_pad2d(g, 1, hid_pad, val=1.0)[0] for g in self.gammas])
        self._betas = jnp.stack([_pad2d(b, 1, hid_pad)[0] for b in self.betas])
        # TODO(synk): lane-pad the output (and slice at the consumer) when
        #   output_dim is large enough for masked stores to matter.
        self._w_out = _pad2d(self.w_bf16[-1], hid_pad, output_dim)
        self._b_out = self.biases[-1]
        assert self._gammas.shape[0] == num_hidden

    def __call__(self, x):
        if self.linear_or_not:
            return linear_forward(x, self._w0, self._b0)
        return fused_mlp_forward(x, self._w0, self._w_mid, self._gammas,
                                 self._betas, self._w_out, self._b_out)


# ---------------------------------------------------------------------------
# Pure-JAX references
# ---------------------------------------------------------------------------
def mlp_ref_f32(mlp, x):
    """Exact PyTorch semantics (f32 weights, bias before BN, training-mode BN)."""
    if mlp.linear_or_not:
        return x @ mlp.weights[0] + mlp.biases[0]
    h = x
    for layer in range(mlp.num_layers - 1):
        z = h @ mlp.weights[layer] + mlp.biases[layer]
        mean = jnp.mean(z, axis=0, keepdims=True)
        var = jnp.mean((z - mean) ** 2, axis=0, keepdims=True)
        z_hat = (z - mean) / jnp.sqrt(var + BN_EPS)
        h = jnp.maximum(z_hat * mlp.gammas[layer] + mlp.betas[layer], 0.0)
    return h @ mlp.weights[-1] + mlp.biases[-1]


def mlp_ref_mixed(mlp, x):
    """Same structure at the kernel's precision: bf16 matmul operands, f32 BN."""
    def mm(h, w):
        return jnp.dot(h.astype(jnp.bfloat16), w, preferred_element_type=jnp.float32)
    if mlp.linear_or_not:
        return mm(x, mlp.w_bf16[0]) + mlp.biases[0]
    h = x
    for layer in range(mlp.num_layers - 1):
        z = mm(h, mlp.w_bf16[layer]) + mlp.biases[layer]
        mean = jnp.mean(z, axis=0, keepdims=True)
        var = jnp.mean((z - mean) ** 2, axis=0, keepdims=True)
        z_hat = (z - mean) * lax.rsqrt(var + BN_EPS)
        h = jnp.maximum(z_hat * mlp.gammas[layer] + mlp.betas[layer], 0.0)
    return mm(h, mlp.w_bf16[-1]) + mlp.biases[-1]


if __name__ == "__main__":
    key = jax.random.PRNGKey(0)
    key, xk, k3, k2, k1 = jax.random.split(key, 5)

    # Present >=128 rows per call (review: fill the MXU rows, amortize weight DMA).
    batch, input_dim, hidden_dim, output_dim = 128, 16, 32, 8
    x = jax.random.normal(xk, (batch, input_dim), jnp.float32)

    # num_layers=3: exercises the HBM->VMEM double-buffered hidden-weight path.
    mlp3 = MLP(3, input_dim, hidden_dim, output_dim, k3)
    out3 = jax.block_until_ready(mlp3(x))
    assert out3.shape == (batch, output_dim)
    assert jnp.allclose(out3, mlp_ref_mixed(mlp3, x), atol=2e-3, rtol=2e-3), \
        "fused MLP (3 layers) mismatch vs mixed-precision reference"
    assert jnp.allclose(out3, mlp_ref_f32(mlp3, x), atol=1e-1, rtol=1e-1), \
        "fused MLP (3 layers) mismatch vs f32 reference (bf16 tolerance)"

    # num_layers=2: single hidden layer, no mid-weight pipeline.
    mlp2 = MLP(2, input_dim, hidden_dim, output_dim, k2)
    out2 = jax.block_until_ready(mlp2(x))
    assert out2.shape == (batch, output_dim)
    assert jnp.allclose(out2, mlp_ref_mixed(mlp2, x), atol=2e-3, rtol=2e-3), \
        "fused MLP (2 layers) mismatch vs mixed-precision reference"
    assert jnp.allclose(out2, mlp_ref_f32(mlp2, x), atol=1e-1, rtol=1e-1), \
        "fused MLP (2 layers) mismatch vs f32 reference (bf16 tolerance)"

    # num_layers=1: plain linear.
    mlp1 = MLP(1, input_dim, hidden_dim, output_dim, k1)
    out1 = jax.block_until_ready(mlp1(x))
    assert out1.shape == (batch, output_dim)
    assert jnp.allclose(out1, mlp_ref_mixed(mlp1, x), atol=2e-3, rtol=2e-3), \
        "linear MLP mismatch vs mixed-precision reference"
    assert jnp.allclose(out1, mlp_ref_f32(mlp1, x), atol=1e-1, rtol=1e-1), \
        "linear MLP mismatch vs f32 reference (bf16 tolerance)"

    print("KERNEL_OK")
</pallas_src>

<mosaic_0001>
module attributes {stable_mosaic.version = 11 : i64} {
  func.func @kernel(%arg0: memref<128x16xf32, #tpu.memory_space<vmem>>, %arg1: memref<16x128xbf16, #tpu.memory_space<vmem>>, %arg2: memref<1x128x128xbf16, #tpu.memory_space<any>>, %arg3: memref<2x128xf32, #tpu.memory_space<vmem>>, %arg4: memref<2x128xf32, #tpu.memory_space<vmem>>, %arg5: memref<128x8xbf16, #tpu.memory_space<vmem>>, %arg6: memref<1x8xf32, #tpu.memory_space<vmem>>, %arg7: memref<128x8xf32, #tpu.memory_space<vmem>>, %arg8: memref<2x128x128xbf16, #tpu.memory_space<vmem>>, %arg9: memref<2x!tpu.dma_semaphore, #tpu.memory_space<semaphore_mem>>) attributes {dimension_semantics = [], scalar_prefetch = 0 : i64, scratch_operands = 2 : i64, tpu.core_type = #tpu.core_type<tc>} {
    %c0_i32 = arith.constant 0 : i32
    %c0_i32_0 = arith.constant 0 : i32
    %c0_i32_1 = arith.constant 0 : i32
    %c0_i32_2 = arith.constant 0 : i32
    %c0_i32_3 = arith.constant 0 : i32
    %0 = tpu.memref_slice %arg2[%c0_i32, %c0_i32_2, %c0_i32_3] : memref<1x128x128xbf16, #tpu.memory_space<any>> -> memref<1x128x128xbf16, #tpu.memory_space<any>>
    %1 = tpu.memref_squeeze %0 : memref<1x128x128xbf16, #tpu.memory_space<any>> -> memref<128x128xbf16, #tpu.memory_space<any>>
    %c0_i32_4 = arith.constant 0 : i32
    %c0_i32_5 = arith.constant 0 : i32
    %2 = tpu.memref_slice %arg8[%c0_i32_0, %c0_i32_4, %c0_i32_5] : memref<2x128x128xbf16, #tpu.memory_space<vmem>> -> memref<1x128x128xbf16, #tpu.memory_space<vmem>>
    %3 = tpu.memref_squeeze %2 : memref<1x128x128xbf16, #tpu.memory_space<vmem>> -> memref<128x128xbf16, #tpu.memory_space<vmem>>
    %4 = tpu.memref_slice %arg9[%c0_i32_1] : memref<2x!tpu.dma_semaphore, #tpu.memory_space<semaphore_mem>> -> memref<1x!tpu.dma_semaphore, #tpu.memory_space<semaphore_mem>>
    %5 = tpu.memref_squeeze %4 : memref<1x!tpu.dma_semaphore, #tpu.memory_space<semaphore_mem>> -> memref<!tpu.dma_semaphore, #tpu.memory_space<semaphore_mem>>
    tpu.enqueue_dma source(%1 : memref<128x128xbf16, #tpu.memory_space<any>>) target(%3 : memref<128x128xbf16, #tpu.memory_space<vmem>>) target_semaphore(%5 : memref<!tpu.dma_semaphore, #tpu.memory_space<semaphore_mem>>)
    %c0 = arith.constant 0 : index
    %c0_6 = arith.constant 0 : index
    %6 = vector.load %arg0[%c0, %c0_6] : memref<128x16xf32, #tpu.memory_space<vmem>>, vector<128x16xf32>
    %c0_7 = arith.constant 0 : index
    %c0_8 = arith.constant 0 : index
    %7 = vector.load %arg1[%c0_7, %c0_8] : memref<16x128xbf16, #tpu.memory_space<vmem>>, vector<16x128xbf16>
    %8 = arith.truncf %6 : vector<128x16xf32> to vector<128x16xbf16>
    %cst = arith.constant dense<0.000000e+00> : vector<128x128xf32>
    %9 = tpu.matmul %8, %7, %cst {dimension_numbers = #tpu.dot_dimension_numbers<[1], [0], [0], [1], [0, 0, 1, 1], [], []>} : vector<128x16xbf16>, vector<16x128xbf16>, vector<128x128xf32> -> vector<128x128xf32>
    %cst_9 = arith.constant dense<0.000000e+00> : vector<128xf32>
    %10 = vector.multi_reduction <add>, %9, %cst_9 [0] : vector<128x128xf32> to vector<128xf32>
    %11 = vector.shape_cast %10 : vector<128xf32> to vector<1x128xf32>
    %cst_10 = arith.constant 1.280000e+02 : f32
    %12 = vector.broadcast %cst_10 : f32 to vector<1x128xf32>
    %13 = arith.divf %11, %12 : vector<1x128xf32>
    %14 = vector.broadcast %13 : vector<1x128xf32> to vector<128x128xf32>
    %15 = arith.subf %9, %14 : vector<128x128xf32>
    %16 = arith.mulf %15, %15 : vector<128x128xf32>
    %cst_11 = arith.constant dense<0.000000e+00> : vector<128xf32>
    %17 = vector.multi_reduction <add>, %16, %cst_11 [0] : vector<128x128xf32> to vector<128xf32>
    %18 = vector.shape_cast %17 : vector<128xf32> to vector<1x128xf32>
    %cst_12 = arith.constant 1.280000e+02 : f32
    %19 = vector.broadcast %cst_12 : f32 to vector<1x128xf32>
    %20 = arith.divf %18, %19 : vector<1x128xf32>
    %c0_13 = arith.constant 0 : index
    %c0_14 = arith.constant 0 : index
    %21 = vector.load %arg3[%c0_13, %c0_14] : memref<2x128xf32, #tpu.memory_space<vmem>>, vector<1x128xf32>
    %cst_15 = arith.constant 9.99999974E-6 : f32
    %22 = vector.broadcast %cst_15 : f32 to vector<1x128xf32>
    %23 = arith.addf %20, %22 : vector<1x128xf32>
    %24 = math.rsqrt %23 : vector<1x128xf32>
    %25 = arith.mulf %21, %24 : vector<1x128xf32>
    %26 = vector.broadcast %25 : vector<1x128xf32> to vector<128x128xf32>
    %27 = arith.mulf %15, %26 : vector<128x128xf32>
    %c0_16 = arith.constant 0 : index
    %c0_17 = arith.constant 0 : index
    %28 = vector.load %arg4[%c0_16, %c0_17] : memref<2x128xf32, #tpu.memory_space<vmem>>, vector<1x128xf32>
    %29 = vector.broadcast %28 : vector<1x128xf32> to vector<128x128xf32>
    %30 = arith.addf %27, %29 : vector<128x128xf32>
    %cst_18 = arith.constant 0.000000e+00 : f32
    %31 = vector.broadcast %cst_18 : f32 to vector<128x128xf32>
    %32 = arith.maximumf %30, %31 : vector<128x128xf32>
    %c0_i32_19 = arith.constant 0 : i32
    %c0_i32_20 = arith.constant 0 : i32
    %c0_i32_21 = arith.constant 0 : i32
    %c0_i32_22 = arith.constant 0 : i32
    %c0_i32_23 = arith.constant 0 : i32
    %33 = tpu.memref_slice %arg2[%c0_i32_19, %c0_i32_22, %c0_i32_23] : memref<1x128x128xbf16, #tpu.memory_space<any>> -> memref<1x128x128xbf16, #tpu.memory_space<any>>
    %34 = tpu.memref_squeeze %33 : memref<1x128x128xbf16, #tpu.memory_space<any>> -> memref<128x128xbf16, #tpu.memory_space<any>>
    %c0_i32_24 = arith.constant 0 : i32
    %c0_i32_25 = arith.constant 0 : i32
    %35 = tpu.memref_slice %arg8[%c0_i32_20, %c0_i32_24, %c0_i32_25] : memref<2x128x128xbf16, #tpu.memory_space<vmem>> -> memref<1x128x128xbf16, #tpu.memory_space<vmem>>
    %36 = tpu.memref_squeeze %35 : memref<1x128x128xbf16, #tpu.memory_space<vmem>> -> memref<128x128xbf16, #tpu.memory_space<vmem>>
    %37 = tpu.memref_slice %arg9[%c0_i32_21] : memref<2x!tpu.dma_semaphore, #tpu.memory_space<semaphore_mem>> -> memref<1x!tpu.dma_semaphore, #tpu.memory_space<semaphore_mem>>
    %38 = tpu.memref_squeeze %37 : memref<1x!tpu.dma_semaphore, #tpu.memory_space<semaphore_mem>> -> memref<!tpu.dma_semaphore, #tpu.memory_space<semaphore_mem>>
    tpu.wait_dma2 semaphore(%38 : memref<!tpu.dma_semaphore, #tpu.memory_space<semaphore_mem>>) src(%34 : memref<128x128xbf16, #tpu.memory_space<any>>) dst(%36 : memref<128x128xbf16, #tpu.memory_space<vmem>>)
    %c0_26 = arith.constant 0 : index
    %c0_27 = arith.constant 0 : index
    %c0_28 = arith.constant 0 : index
    %39 = vector.load %arg8[%c0_26, %c0_27, %c0_28] : memref<2x128x128xbf16, #tpu.memory_space<vmem>>, vector<1x128x128xbf16>
    %40 = vector.shape_cast %39 : vector<1x128x128xbf16> to vector<128x128xbf16>
    %41 = arith.truncf %32 : vector<128x128xf32> to vector<128x128xbf16>
    %cst_29 = arith.constant dense<0.000000e+00> : vector<128x128xf32>
    %42 = tpu.matmul %41, %40, %cst_29 {dimension_numbers = #tpu.dot_dimension_numbers<[1], [0], [0], [1], [0, 0, 1, 1], [], []>} : vector<128x128xbf16>, vector<128x128xbf16>, vector<128x128xf32> -> vector<128x128xf32>
    %cst_30 = arith.constant dense<0.000000e+00> : vector<128xf32>
    %43 = vector.multi_reduction <add>, %42, %cst_30 [0] : vector<128x128xf32> to vector<128xf32>
    %44 = vector.shape_cast %43 : vector<128xf32> to vector<1x128xf32>
    %cst_31 = arith.constant 1.280000e+02 : f32
    %45 = vector.broadcast %cst_31 : f32 to vector<1x128xf32>
    %46 = arith.divf %44, %45 : vector<1x128xf32>
    %47 = vector.broadcast %46 : vector<1x128xf32> to vector<128x128xf32>
    %48 = arith.subf %42, %47 : vector<128x128xf32>
    %49 = arith.mulf %48, %48 : vector<128x128xf32>
    %cst_32 = arith.constant dense<0.000000e+00> : vector<128xf32>
    %50 = vector.multi_reduction <add>, %49, %cst_32 [0] : vector<128x128xf32> to vector<128xf32>
    %51 = vector.shape_cast %50 : vector<128xf32> to vector<1x128xf32>
    %cst_33 = arith.constant 1.280000e+02 : f32
    %52 = vector.broadcast %cst_33 : f32 to vector<1x128xf32>
    %53 = arith.divf %51, %52 : vector<1x128xf32>
    %c1 = arith.constant 1 : index
    %c0_34 = arith.constant 0 : index
    %54 = vector.load %arg3[%c1, %c0_34] : memref<2x128xf32, #tpu.memory_space<vmem>>, vector<1x128xf32>
    %cst_35 = arith.constant 9.99999974E-6 : f32
    %55 = vector.broadcast %cst_35 : f32 to vector<1x128xf32>
    %56 = arith.addf %53, %55 : vector<1x128xf32>
    %57 = math.rsqrt %56 : vector<1x128xf32>
    %58 = arith.mulf %54, %57 : vector<1x128xf32>
    %59 = vector.broadcast %58 : vector<1x128xf32> to vector<128x128xf32>
    %60 = arith.mulf %48, %59 : vector<128x128xf32>
    %c1_36 = arith.constant 1 : index
    %c0_37 = arith.constant 0 : index
    %61 = vector.load %arg4[%c1_36, %c0_37] : memref<2x128xf32, #tpu.memory_space<vmem>>, vector<1x128xf32>
    %62 = vector.broadcast %61 : vector<1x128xf32> to vector<128x128xf32>
    %63 = arith.addf %60, %62 : vector<128x128xf32>
    %cst_38 = arith.constant 0.000000e+00 : f32
    %64 = vector.broadcast %cst_38 : f32 to vector<128x128xf32>
    %65 = arith.maximumf %63, %64 : vector<128x128xf32>
    %66 = arith.truncf %65 : vector<128x128xf32> to vector<128x128xbf16>
    %c0_39 = arith.constant 0 : index
    %c0_40 = arith.constant 0 : index
    %67 = vector.load %arg5[%c0_39, %c0_40] : memref<128x8xbf16, #tpu.memory_space<vmem>>, vector<128x8xbf16>
    %cst_41 = arith.constant dense<0.000000e+00> : vector<128x8xf32>
    %68 = tpu.matmul %66, %67, %cst_41 {dimension_numbers = #tpu.dot_dimension_numbers<[1], [0], [0], [1], [0, 0, 1, 1], [], []>} : vector<128x128xbf16>, vector<128x8xbf16>, vector<128x8xf32> -> vector<128x8xf32>
    %c0_42 = arith.constant 0 : index
    %c0_43 = arith.constant 0 : index
    %69 = vector.load %arg6[%c0_42, %c0_43] : memref<1x8xf32, #tpu.memory_space<vmem>>, vector<1x8xf32>
    %70 = vector.broadcast %69 : vector<1x8xf32> to vector<128x8xf32>
    %71 = arith.addf %68, %70 : vector<128x8xf32>
    %c0_44 = arith.constant 0 : index
    %c0_45 = arith.constant 0 : index
    %72 = vector.load %arg7[%c0_44, %c0_45] : memref<128x8xf32, #tpu.memory_space<vmem>>, vector<128x8xf32>
    tpu.vector_store %arg7[%c0_44, %c0_45], %71 {strides = array<i32>} : memref<128x8xf32, #tpu.memory_space<vmem>>, vector<128x8xf32>,
    return
  }
}

</mosaic_0001>

<bundles_post_ra>
// kernel: tpu_custom_call.1
= control target key start
LH: loop header
LB: loop body
LE: loop exit
PB: predicated region body
PF: predicated region fallthrough
CT: control target
= control target key end

     0   :  { %s1361_s0 = inlined_call_operand.vmem [shape: f32[128,16], index: 0, kind: input, shape index: {}]   ;;  %s1362_s1 = inlined_call_operand.vmem [shape: bf16[16,128], index: 1, kind: input, shape index: {}]   ;;  %s1363_s2 = inlined_call_operand.vmem [shape: bf16[1,128,128], index: 2, kind: input, shape index: {}]   ;;  %s1364_s3 = inlined_call_operand.vmem [shape: f32[2,128], index: 3, kind: input, shape index: {}]   ;;  %s1365_s4 = inlined_call_operand.vmem [shape: f32[2,128], index: 4, kind: input, shape index: {}]   ;;  %s1366_s5 = inlined_call_operand.vmem [shape: bf16[128,8], index: 5, kind: input, shape index: {}]   ;;  %s1367_s6 = inlined_call_operand.vmem [shape: f32[1,8], index: 6, kind: input, shape index: {}]   ;;  %s1368_s7 = inlined_call_operand.vmem [shape: f32[128,8], index: 7, kind: output, shape index: {}]  }
   0x1   :  { %v58_v0 = vld [vmem:[%s1363_s2] sm:$0xff]  ;;  %v60_v1 = vld [vmem:[%s1363_s2 + $0x8] sm:$0xff]  ;;  %v62_v2 = vld [vmem:[%s1363_s2 + $0x10] sm:$0xff] }
   0x2   :  { %59 = vst [vmem:[#allocation2] sm:$0xff] %v58_v0  ;;  %61 = vst [vmem:[#allocation2 + $0x8] sm:$0xff] %v60_v1  ;;  %v64_v3 = vld [vmem:[%s1363_s2 + $0x18] sm:$0xff]  ;;  %v66_v4 = vld [vmem:[%s1363_s2 + $0x20] sm:$0xff] }
   0x3   :  { %63 = vst [vmem:[#allocation2 + $0x10] sm:$0xff] %v62_v2  ;;  %v68_v5 = vld [vmem:[%s1363_s2 + $0x28] sm:$0xff]  ;;  %65 = vst [vmem:[#allocation2 + $0x18] sm:$0xff] %v64_v3  ;;  %v70_v6 = vld [vmem:[%s1363_s2 + $0x30] sm:$0xff] }
   0x4   :  { %67 = vst [vmem:[#allocation2 + $0x20] sm:$0xff] %v66_v4  ;;  %69 = vst [vmem:[#allocation2 + $0x28] sm:$0xff] %v68_v5  ;;  %v72_v7 = vld [vmem:[%s1363_s2 + $0x38] sm:$0xff] }
   0x5   :  { %71 = vst [vmem:[#allocation2 + $0x30] sm:$0xff] %v70_v6  ;;  %73 = vst [vmem:[#allocation2 + $0x38] sm:$0xff] %v72_v7 }
   0x6   :  { %81 = vsyncadd [#allocation3], 1024  ;;  %v1055_v8 = vld [vmem:[%s1362_s1] sm:$0xff]   ;;  %v83_v10 = vld [vmem:[%s1361_s0 + $0x8] sm:$0xff]  ;;  %vm114_vm0 = vcmask 130048  }
   0x7   :  { %v82_v9 = vld [vmem:[%s1361_s0] sm:$0xff]  ;;  %v84_v12 = vld [vmem:[%s1361_s0 + $0x10] sm:$0xff]  ;;  %v85_v13 = vld [vmem:[%s1361_s0 + $0x18] sm:$0xff]  ;;  %973 = vmatprep.subr.bf16.mxu0 %v1055_v8 }
   0x8   :  { %v100_v11 = vpack.c.bf16 %v83_v10, %v82_v9  ;;  %v86_v14 = vld [vmem:[%s1361_s0 + $0x20] sm:$0xff]  ;;  %v101_v15 = vpack.c.bf16 %v85_v13, %v84_v12  ;;  %v87_v16 = vld [vmem:[%s1361_s0 + $0x28] sm:$0xff]  ;;  %974 = vmatpush3.bf16.msra.mxu0 %v1055_v8  ;;  %v88_v18 = vld [vmem:[%s1361_s0 + $0x30] sm:$0xff] }
   0x9   :  { %v102_v17 = vpack.c.bf16 %v87_v16, %v86_v14  ;;  %v89_v19 = vld [vmem:[%s1361_s0 + $0x38] sm:$0xff]  ;;  %v90_v20 = vld [vmem:[%s1361_s0 + $0x40] sm:$0xff]  ;;  %v91_v21 = vld [vmem:[%s1361_s0 + $0x48] sm:$0xff] }
   0xa   :  { %975 = vmatprep.mubr.msk.bf16.mxu0 %vm114_vm0, %v100_v11  ;;  %v103_v22 = vpack.c.bf16 %v89_v19, %v88_v18  ;;  %v104_v23 = vpack.c.bf16 %v91_v21, %v90_v20  ;;  %v92_v24 = vld [vmem:[%s1361_s0 + $0x50] sm:$0xff]  ;;  %v93_v25 = vld [vmem:[%s1361_s0 + $0x58] sm:$0xff]  ;;  %v94_v26 = vld [vmem:[%s1361_s0 + $0x60] sm:$0xff] }
   0xb   :  { %976 = vmatmul.mubr.msk.bf16.vlgmr.msra.gmra.mxu0 %vm114_vm0, %v101_v15  ;;  %v95_v27 = vld [vmem:[%s1361_s0 + $0x68] sm:$0xff]  ;;  %v105_v28 = vpack.c.bf16 %v93_v25, %v92_v24  ;;  %v96_v30 = vld [vmem:[%s1361_s0 + $0x70] sm:$0xff]  ;;  %v97_v31 = vld [vmem:[%s1361_s0 + $0x78] sm:$0xff] }
   0xc   :  { %979 = vmatprep.mubr.msk.bf16.mxu0 %vm114_vm0, %v102_v17  ;;  %v106_v29 = vpack.c.bf16 %v95_v27, %v94_v26  ;;  %v107_v32 = vpack.c.bf16 %v97_v31, %v96_v30 }
  0x13   :  { %980 = vmatmul.mubr.msk.bf16.gmra.mxu0 %vm114_vm0, %v103_v22 }
  0x14   :  { %983 = vmatprep.mubr.msk.bf16.mxu0 %vm114_vm0, %v104_v23 }
  0x1b   :  { %984 = vmatmul.mubr.msk.bf16.gmra.mxu0 %vm114_vm0, %v105_v28 }
  0x1c   :  { %987 = vmatprep.mubr.msk.bf16.mxu0 %vm114_vm0, %v106_v29 }
  0x23   :  { %988 = vmatmul.mubr.msk.bf16.gmra.mxu0 %vm114_vm0, %v107_v32 }
  0xcb   :  { %v977_v33 = vpop.f32.mrf.mxu0 }
  0xcd   :  { %v173_v34 = vpop.f32.mrf.mxu0 }
  0xcf   :  { %v978_v35 = vpop.f32.mrf.mxu0 }
  0xd1   :  { %v176_v36 = vpop.f32.mrf.mxu0 }
  0xd2   :  { %v236_v37 = vadd.f32 %v176_v36, %v173_v34 }
  0xd3   :  { %v981_v38 = vpop.f32.mrf.mxu0 }
  0xd4   :  { %v237_v39 = vadd.f32 %v977_v33, %v236_v37 }
  0xd5   :  { %v189_v40 = vpop.f32.mrf.mxu0 }
  0xd6   :  { %v238_v41 = vadd.f32 %v978_v35, %v237_v39 }
  0xd7   :  { %v982_v42 = vpop.f32.mrf.mxu0 }
  0xd8   :  { %v239_v43 = vadd.f32 %v238_v41, %v189_v40 }
  0xd9   :  { %v192_v44 = vpop.f32.mrf.mxu0 }
  0xda   :  { %v240_v45 = vadd.f32 %v239_v43, %v192_v44 }
  0xdb   :  { %v985_v46 = vpop.f32.mrf.mxu0 }
  0xdc   :  { %v241_v47 = vadd.f32 %v981_v38, %v240_v45 }
  0xdd   :  { %v205_v48 = vpop.f32.mrf.mxu0 }
  0xde   :  { %v242_v49 = vadd.f32 %v982_v42, %v241_v47 }
  0xdf   :  { %v986_v50 = vpop.f32.mrf.mxu0 }
  0xe0   :  { %v243_v51 = vadd.f32 %v242_v49, %v205_v48 }
  0xe1   :  { %v208_v52 = vpop.f32.mrf.mxu0 }
  0xe2   :  { %v244_v53 = vadd.f32 %v243_v51, %v208_v52 }
  0xe3   :  { %v989_v54 = vpop.f32.mrf.mxu0 }
  0xe4   :  { %v245_v55 = vadd.f32 %v985_v46, %v244_v53 }
  0xe5   :  { %v221_v56 = vpop.f32.mrf.mxu0 }
  0xe6   :  { %v246_v57 = vadd.f32 %v986_v50, %v245_v55 }
  0xe7   :  { %v990_v58 = vpop.f32.mrf.mxu0 }
  0xe8   :  { %v247_v59 = vadd.f32 %v246_v57, %v221_v56 }
  0xe9   :  { %v224_v60 = vpop.f32.mrf.mxu0 }
  0xea   :  { %v248_v61 = vadd.f32 %v247_v59, %v224_v60 }
  0xec   :  { %v249_v62 = vadd.f32 %v989_v54, %v248_v61 }
  0xee   :  { %v250_v63 = vadd.f32 %v990_v58, %v249_v62 }
  0xf0   :  { %v251_v0 = vrot.slane %v250_v63, 4 }
  0xf2   :  { %v252_v1 = vadd.f32 %v251_v0, %v250_v63 }
  0xf4   :  { %v253_v2 = vrot.slane %v252_v1, 2 }
  0xf6   :  { %v254_v3 = vadd.f32 %v253_v2, %v252_v1 }
  0xf8   :  { %v255_v4 = vrot.slane %v254_v3, 1 }
  0xfa   :  { %v256_v5 = vadd.f32 %v255_v4, %v254_v3 }
  0xfc   :  { %v258_v6 = vmul.f32 0.0078125, %v256_v5 }
  0xfe   :  { %v1201_v7 = vsub.f32 %v173_v34, %v258_v6  ;;  %v1203_v8 = vsub.f32 %v176_v36, %v258_v6  ;;  %v1205_v9 = vsub.f32 %v977_v33, %v258_v6  ;;  %v262_v12 = vsub.f32 %v978_v35, %v258_v6 }
  0xff   :  { %v263_v13 = vsub.f32 %v189_v40, %v258_v6  ;;  %v264_v16 = vsub.f32 %v192_v44, %v258_v6  ;;  %v265_v19 = vsub.f32 %v981_v38, %v258_v6  ;;  %v266_v22 = vsub.f32 %v982_v42, %v258_v6 }
 0x100   :  { %v275_v10 = vmul.f32 %v1201_v7, %v1201_v7  ;;  %v276_v11 = vmul.f32 %v1203_v8, %v1203_v8  ;;  %v277_v14 = vmul.f32 %v1205_v9, %v1205_v9  ;;  %v278_v17 = vmul.f32 %v262_v12, %v262_v12 }
 0x101   :  { %v279_v20 = vmul.f32 %v263_v13, %v263_v13  ;;  %v280_v23 = vmul.f32 %v264_v16, %v264_v16  ;;  %v267_v25 = vsub.f32 %v205_v48, %v258_v6  ;;  %v281_v26 = vmul.f32 %v265_v19, %v265_v19 }
 0x102   :  { %v291_v15 = vadd.f32 %v276_v11, %v275_v10  ;;  %v268_v28 = vsub.f32 %v208_v52, %v258_v6  ;;  %v282_v29 = vmul.f32 %v266_v22, %v266_v22  ;;  %v269_v31 = vsub.f32 %v985_v46, %v258_v6 }
 0x103   :  { %v283_v32 = vmul.f32 %v267_v25, %v267_v25  ;;  %v270_v34 = vsub.f32 %v986_v50, %v258_v6  ;;  %v271_v37 = vsub.f32 %v221_v56, %v258_v6  ;;  %v272_v40 = vsub.f32 %v224_v60, %v258_v6 }
 0x104   :  { %v292_v18 = vadd.f32 %v291_v15, %v277_v14  ;;  %v284_v35 = vmul.f32 %v268_v28, %v268_v28  ;;  %v285_v39 = vmul.f32 %v269_v31, %v269_v31  ;;  %v273_v43 = vsub.f32 %v989_v54, %v258_v6 }
 0x105   :  { %v286_v41 = vmul.f32 %v270_v34, %v270_v34  ;;  %v287_v44 = vmul.f32 %v271_v37, %v271_v37  ;;  %v274_v47 = vsub.f32 %v990_v58, %v258_v6  ;;  %v288_v48 = vmul.f32 %v272_v40, %v272_v40  ;;  %v313_v58 = vld [vmem:[%s1364_s3] sm:$0x1] }
 0x106   :  { %v293_v21 = vadd.f32 %v292_v18, %v278_v17  ;;  %v289_v51 = vmul.f32 %v273_v43, %v273_v43  ;;  %v317_v54 = vlaneseq }
 0x107   :  { %v290_v46 = vmul.f32 %v274_v47, %v274_v47 }
 0x108   :  { %v294_v24 = vadd.f32 %v293_v21, %v279_v20  ;;  %v1213_v0 = vshrl.u32 %v317_v54, 7  ;;  %v911_v20 = vld [vmem:[%s1365_s4] ss:$0 sm:$0xff] }
 0x10a   :  { %v295_v27 = vadd.f32 %v294_v24, %v280_v23  ;;  %v319_v1 = vsub.s32 0, %v1213_v0 }
 0x10c   :  { %v296_v30 = vadd.f32 %v295_v27, %v281_v26 }
 0x10e   :  { %v297_v33 = vadd.f32 %v296_v30, %v282_v29 }
 0x110   :  { %v298_v36 = vadd.f32 %v297_v33, %v283_v32 }
 0x112   :  { %v299_v38 = vadd.f32 %v298_v36, %v284_v35 }
 0x114   :  { %v300_v42 = vadd.f32 %v299_v38, %v285_v39 }
 0x116   :  { %v301_v45 = vadd.f32 %v300_v42, %v286_v41 }
 0x118   :  { %v302_v49 = vadd.f32 %v301_v45, %v287_v44 }
 0x11a   :  { %v303_v52 = vadd.f32 %v302_v49, %v288_v48 }
 0x11c   :  { %v304_v53 = vadd.f32 %v303_v52, %v289_v51 }
 0x11e   :  { %v305_v55 = vadd.f32 %v304_v53, %v290_v46 }
 0x120   :  { %v306_v50 = vrot.slane %v305_v55, 4 }
 0x122   :  { %v307_v57 = vadd.f32 %v306_v50, %v305_v55 }
 0x124   :  { %v308_v59 = vrot.slane %v307_v57, 2 }
 0x126   :  { %v309_v56 = vadd.f32 %v308_v59, %v307_v57 }
 0x128   :  { %v310_v61 = vrot.slane %v309_v56, 1 }
 0x12a   :  { %v311_v62 = vadd.f32 %v310_v61, %v309_v56 }
 0x12c   :  { %v312_v60 = vmul.f32 0.0078125, %v311_v62 }
 0x12e   :  { %v314_v63 = vadd.f32 1e-05, %v312_v60 }
 0x130   :  { %1056 = vrsqrt.f32 %v314_v63 }
 0x13d   :  { %v1057_v2 = vpop.eup %1056 }
 0x13e   :  { %v316_v3 = vmul.f32 %v1057_v2, %v313_v58 }
 0x140   :  { %v320_v4 = vrot.slane %v316_v3, %v319_v1 }
 0x142   :  { %v321_v5 = vmul.f32 %v320_v4, %v1201_v7  ;;  %v322_v6 = vmul.f32 %v320_v4, %v1203_v8  ;;  %v323_v10 = vmul.f32 %v320_v4, %v1205_v9  ;;  %v324_v11 = vmul.f32 %v320_v4, %v262_v12 }
 0x143   :  { %v325_v14 = vmul.f32 %v320_v4, %v263_v13  ;;  %v326_v15 = vmul.f32 %v320_v4, %v264_v16  ;;  %v327_v17 = vmul.f32 %v320_v4, %v265_v19  ;;  %v328_v18 = vmul.f32 %v320_v4, %v266_v22 }
 0x144   :  { %v329_v21 = vmul.f32 %v320_v4, %v267_v25  ;;  %v330_v23 = vmul.f32 %v320_v4, %v268_v28  ;;  %v331_v24 = vmul.f32 %v320_v4, %v269_v31  ;;  %v332_v26 = vmul.f32 %v320_v4, %v270_v34 }
 0x145   :  { %v333_v27 = vmul.f32 %v320_v4, %v271_v37  ;;  %v334_v29 = vmul.f32 %v320_v4, %v272_v40  ;;  %v335_v7 = vmul.f32 %v320_v4, %v273_v43  ;;  %v336_v30 = vmul.f32 %v320_v4, %v274_v47 }
 0x146   :  { %v342_v8 = vadd.f32 %v911_v20, %v321_v5  ;;  %v343_v32 = vadd.f32 %v911_v20, %v322_v6  ;;  %v344_v9 = vadd.f32 %v911_v20, %v323_v10  ;;  %v345_v12 = vadd.f32 %v911_v20, %v324_v11 }
 0x147   :  { %v346_v13 = vadd.f32 %v911_v20, %v325_v14  ;;  %v347_v16 = vadd.f32 %v911_v20, %v326_v15  ;;  %v348_v19 = vadd.f32 %v911_v20, %v327_v17  ;;  %v349_v22 = vadd.f32 %v911_v20, %v328_v18 }
 0x148   :  { %v350_v33 = vadd.f32 %v911_v20, %v329_v21  ;;  %v351_v35 = vadd.f32 %v911_v20, %v330_v23  ;;  %v352_v36 = vadd.f32 %v911_v20, %v331_v24  ;;  %v353_v39 = vadd.f32 %v911_v20, %v332_v26 }
 0x149   :  { %v354_v25 = vadd.f32 %v911_v20, %v333_v27  ;;  %v355_v28 = vadd.f32 %v911_v20, %v334_v29  ;;  %v356_v31 = vadd.f32 %v911_v20, %v335_v7  ;;  %v357_v34 = vadd.f32 %v911_v20, %v336_v30 }
 0x14a   :  { %v358_v37 = vmax.f32 %v342_v8, 0.0  ;;  %v359_v38 = vmax.f32 %v343_v32, 0.0  ;;  %v360_v40 = vmax.f32 %v344_v9, 0.0  ;;  %v361_v41 = vmax.f32 %v345_v12, 0.0 }
 0x14b   :  { %v362_v42 = vmax.f32 %v346_v13, 0.0  ;;  %v363_v43 = vmax.f32 %v347_v16, 0.0  ;;  %v364_v44 = vmax.f32 %v348_v19, 0.0  ;;  %v365_v45 = vmax.f32 %v349_v22, 0.0 }
 0x14c   :  { %v366_v47 = vmax.f32 %v350_v33, 0.0  ;;  %v367_v48 = vmax.f32 %v351_v35, 0.0  ;;  %v368_v49 = vmax.f32 %v352_v36, 0.0  ;;  %v369_v51 = vmax.f32 %v353_v39, 0.0 }
 0x14d   :  { %v370_v52 = vmax.f32 %v354_v25, 0.0  ;;  %v371_v46 = vmax.f32 %v355_v28, 0.0  ;;  %v372_v53 = vmax.f32 %v356_v31, 0.0  ;;  %v373_v55 = vmax.f32 %v357_v34, 0.0 }
 0x14e   :  { %1076 = dma.done.wait [#allocation3], 1024 }
 0x14f   :  { %1077 = vsyncadd [#allocation3], 4294966272  ;;  %v394_v50 = vpack.c.bf16 %v359_v38, %v358_v37  ;;  %v1058_v57 = vld [vmem:[#allocation2 + $0x38] sm:$0xff]   ;;  %v1059_v59 = vld [vmem:[#allocation2 + $0x30] sm:$0xff]   ;;  %v395_v58 = vpack.c.bf16 %v361_v41, %v360_v40  ;;  %v396_v2 = vpack.c.bf16 %v363_v43, %v362_v42  ;;  %v397_v3 = vpack.c.bf16 %v365_v45, %v364_v44 }
 0x150   :  { %991 = vmatprep.subr.bf16.mxu1 %v1058_v57  ;;  %v1060_v56 = vld [vmem:[#allocation2 + $0x28] sm:$0xff]   ;;  %v1061_v61 = vld [vmem:[#allocation2 + $0x20] sm:$0xff]   ;;  %v1062_v62 = vld [vmem:[#allocation2 + $0x18] sm:$0xff]   ;;  %v398_v4 = vpack.c.bf16 %v367_v48, %v366_v47  ;;  %v399_v5 = vpack.c.bf16 %v369_v51, %v368_v49  ;;  %v400_v6 = vpack.c.bf16 %v371_v46, %v370_v52  ;;  %v401_v10 = vpack.c.bf16 %v373_v55, %v372_v53 }
 0x151   :  { %1007 = vmatprep.mubr.bf16.mxu1 %v394_v50  ;;  %992 = vmatpush3.bf16.msra.mxu1 %v1058_v57  ;;  %v1063_v60 = vld [vmem:[#allocation2 + $0x10] sm:$0xff]   ;;  %v1064_v63 = vld [vmem:[#allocation2 + $0x8] sm:$0xff]   ;;  %v1065_v54 = vld [vmem:[#allocation2] sm:$0xff]   ;;  %vm860_vm1 = vcmask 64512  }
 0x152   :  { %993 = vmatprep.subr.bf16.mxu1 %v1059_v59  ;;  %v1066_v11 = vld [vmem:[%s1366_s5 + $0x38] sm:$0xff]   ;;  %v1067_v14 = vld [vmem:[%s1366_s5 + $0x30] sm:$0xff]   ;;  %v1068_v15 = vld [vmem:[%s1366_s5 + $0x28] sm:$0xff]  }
 0x153   :  { %1023 = vmatprep.subr.bf16.mxu0 %v1066_v11  ;;  %v1069_v17 = vld [vmem:[%s1366_s5 + $0x20] sm:$0xff]   ;;  %v1070_v18 = vld [vmem:[%s1366_s5 + $0x18] sm:$0xff]   ;;  %v1071_v20 = vld [vmem:[%s1366_s5 + $0x10] sm:$0xff]  }
 0x154   :  { %1024 = vmatpush3.bf16.msra.mxu0 %v1066_v11  ;;  %v1072_v21 = vld [vmem:[%s1366_s5 + $0x8] sm:$0xff]   ;;  %v1073_v23 = vld [vmem:[%s1366_s5] sm:$0xff]  }
 0x155   :  { %994 = vmatpush3.bf16.msra.mxu1 %v1059_v59  ;;  %1025 = vmatprep.subr.bf16.mxu0 %v1067_v14 }
 0x156   :  { %995 = vmatprep.subr.bf16.mxu1 %v1060_v56 }
 0x158   :  { %1026 = vmatpush3.bf16.msra.mxu0 %v1067_v14 }
 0x159   :  { %996 = vmatpush3.bf16.msra.mxu1 %v1060_v56  ;;  %1027 = vmatprep.subr.bf16.mxu0 %v1068_v15 }
 0x15a   :  { %997 = vmatprep.subr.bf16.mxu1 %v1061_v61 }
 0x15c   :  { %1028 = vmatpush3.bf16.msra.mxu0 %v1068_v15 }
 0x15d   :  { %998 = vmatpush3.bf16.msra.mxu1 %v1061_v61  ;;  %1029 = vmatprep.subr.bf16.mxu0 %v1069_v17 }
 0x15e   :  { %999 = vmatprep.subr.bf16.mxu1 %v1062_v62 }
 0x160   :  { %1030 = vmatpush3.bf16.msra.mxu0 %v1069_v17 }
 0x161   :  { %1000 = vmatpush3.bf16.msra.mxu1 %v1062_v62  ;;  %1031 = vmatprep.subr.bf16.mxu0 %v1070_v18 }
 0x162   :  { %1001 = vmatprep.subr.bf16.mxu1 %v1063_v60 }
 0x164   :  { %1032 = vmatpush3.bf16.msra.mxu0 %v1070_v18 }
 0x165   :  { %1002 = vmatpush3.bf16.msra.mxu1 %v1063_v60  ;;  %1033 = vmatprep.subr.bf16.mxu0 %v1071_v20 }
 0x166   :  { %1003 = vmatprep.subr.bf16.mxu1 %v1064_v63 }
 0x168   :  { %1034 = vmatpush3.bf16.msra.mxu0 %v1071_v20 }
 0x169   :  { %1004 = vmatpush3.bf16.msra.mxu1 %v1064_v63  ;;  %1035 = vmatprep.subr.bf16.mxu0 %v1072_v21 }
 0x16a   :  { %1005 = vmatprep.subr.bf16.mxu1 %v1065_v54 }
 0x16c   :  { %1036 = vmatpush3.bf16.msra.mxu0 %v1072_v21 }
 0x16d   :  { %1006 = vmatpush3.bf16.msra.mxu1 %v1065_v54  ;;  %1037 = vmatprep.subr.bf16.mxu0 %v1073_v23 }
 0x170   :  { %1008 = vmatmul.mubr.bf16.vlgmr.msra.gmra.mxu1 %v395_v58  ;;  %1038 = vmatpush3.bf16.msra.mxu0 %v1073_v23 }
 0x171   :  { %1011 = vmatprep.mubr.bf16.mxu1 %v396_v2 }
 0x178   :  { %1012 = vmatmul.mubr.bf16.gmra.mxu1 %v397_v3 }
 0x179   :  { %1015 = vmatprep.mubr.bf16.mxu1 %v398_v4 }
 0x180   :  { %1016 = vmatmul.mubr.bf16.gmra.mxu1 %v399_v5 }
 0x181   :  { %1019 = vmatprep.mubr.bf16.mxu1 %v400_v6 }
 0x188   :  { %1020 = vmatmul.mubr.bf16.gmra.mxu1 %v401_v10 }
 0x230   :  { %v1009_v24 = vpop.f32.mrf.mxu1 }
 0x232   :  { %v484_v26 = vpop.f32.mrf.mxu1 }
 0x234   :  { %v1010_v27 = vpop.f32.mrf.mxu1 }
 0x236   :  { %v487_v29 = vpop.f32.mrf.mxu1 }
 0x237   :  { %v547_v7 = vadd.f32 %v487_v29, %v484_v26 }
 0x238   :  { %v1013_v30 = vpop.f32.mrf.mxu1 }
 0x239   :  { %v548_v8 = vadd.f32 %v1009_v24, %v547_v7 }
 0x23a   :  { %v500_v32 = vpop.f32.mrf.mxu1 }
 0x23b   :  { %v549_v9 = vadd.f32 %v1010_v27, %v548_v8 }
 0x23c   :  { %v1014_v12 = vpop.f32.mrf.mxu1 }
 0x23d   :  { %v550_v13 = vadd.f32 %v549_v9, %v500_v32 }
 0x23e   :  { %v503_v16 = vpop.f32.mrf.mxu1 }
 0x23f   :  { %v551_v19 = vadd.f32 %v550_v13, %v503_v16 }
 0x240   :  { %v1017_v22 = vpop.f32.mrf.mxu1 }
 0x241   :  { %v552_v33 = vadd.f32 %v1013_v30, %v551_v19 }
 0x242   :  { %v516_v35 = vpop.f32.mrf.mxu1 }
 0x243   :  { %v553_v36 = vadd.f32 %v1014_v12, %v552_v33 }
 0x244   :  { %v1018_v39 = vpop.f32.mrf.mxu1 }
 0x245   :  { %v554_v25 = vadd.f32 %v553_v36, %v516_v35 }
 0x246   :  { %v519_v28 = vpop.f32.mrf.mxu1 }
 0x247   :  { %v555_v31 = vadd.f32 %v554_v25, %v519_v28 }
 0x248   :  { %v1021_v34 = vpop.f32.mrf.mxu1 }
 0x249   :  { %v556_v37 = vadd.f32 %v1017_v22, %v555_v31 }
 0x24a   :  { %v532_v38 = vpop.f32.mrf.mxu1 }
 0x24b   :  { %v557_v40 = vadd.f32 %v1018_v39, %v556_v37 }
 0x24c   :  { %v1022_v41 = vpop.f32.mrf.mxu1 }
 0x24d   :  { %v558_v42 = vadd.f32 %v557_v40, %v532_v38 }
 0x24e   :  { %v535_v43 = vpop.f32.mrf.mxu1 }
 0x24f   :  { %v559_v44 = vadd.f32 %v558_v42, %v535_v43 }
 0x251   :  { %v560_v45 = vadd.f32 %v1021_v34, %v559_v44 }
 0x253   :  { %v561_v47 = vadd.f32 %v1022_v41, %v560_v45 }
 0x255   :  { %v562_v48 = vrot.slane %v561_v47, 4 }
 0x257   :  { %v563_v49 = vadd.f32 %v562_v48, %v561_v47  ;;  %v623_v48 = vld [vmem:[%s1364_s3 + $0x1] sm:$0x1] }
 0x259   :  { %v564_v51 = vrot.slane %v563_v49, 2 }
 0x25b   :  { %v565_v52 = vadd.f32 %v564_v51, %v563_v49 }
 0x25d   :  { %v566_v46 = vrot.slane %v565_v52, 1 }
 0x25f   :  { %v567_v53 = vadd.f32 %v566_v46, %v565_v52  ;;  %v920_v46 = vld [vmem:[%s1365_s4 + $0x1] ss:$0 sm:$0xff] }
 0x261   :  { %v568_v55 = vmul.f32 0.0078125, %v567_v53 }
 0x263   :  { %v569_v50 = vsub.f32 %v484_v26, %v568_v55  ;;  %v570_v57 = vsub.f32 %v487_v29, %v568_v55  ;;  %v571_v59 = vsub.f32 %v1009_v24, %v568_v55  ;;  %v572_v62 = vsub.f32 %v1010_v27, %v568_v55 }
 0x264   :  { %v573_v60 = vsub.f32 %v500_v32, %v568_v55  ;;  %v574_v58 = vsub.f32 %v503_v16, %v568_v55  ;;  %v575_v4 = vsub.f32 %v1013_v30, %v568_v55  ;;  %v576_v10 = vsub.f32 %v1014_v12, %v568_v55 }
 0x265   :  { %v585_v56 = vmul.f32 %v569_v50, %v569_v50  ;;  %v586_v61 = vmul.f32 %v570_v57, %v570_v57  ;;  %v587_v63 = vmul.f32 %v571_v59, %v571_v59  ;;  %v588_v2 = vmul.f32 %v572_v62, %v572_v62 }
 0x266   :  { %v589_v5 = vmul.f32 %v573_v60, %v573_v60  ;;  %v590_v11 = vmul.f32 %v574_v58, %v574_v58  ;;  %v1251_v15 = vsub.f32 %v516_v35, %v568_v55  ;;  %v591_v17 = vmul.f32 %v575_v4, %v575_v4 }
 0x267   :  { %v601_v54 = vadd.f32 %v586_v61, %v585_v56  ;;  %v578_v20 = vsub.f32 %v519_v28, %v568_v55  ;;  %v592_v21 = vmul.f32 %v576_v10, %v576_v10  ;;  %v1253_v24 = vsub.f32 %v1017_v22, %v568_v55 }
 0x268   :  { %v593_v26 = vmul.f32 %v1251_v15, %v1251_v15  ;;  %v1257_v29 = vsub.f32 %v1018_v39, %v568_v55  ;;  %v1259_v8 = vsub.f32 %v532_v38, %v568_v55  ;;  %v1263_v12 = vsub.f32 %v535_v43, %v568_v55 }
 0x269   :  { %v602_v3 = vadd.f32 %v601_v54, %v587_v63  ;;  %v594_v7 = vmul.f32 %v578_v20, %v578_v20  ;;  %v595_v32 = vmul.f32 %v1253_v24, %v1253_v24  ;;  %v1267_v19 = vsub.f32 %v1021_v34, %v568_v55 }
 0x26a   :  { %v596_v13 = vmul.f32 %v1257_v29, %v1257_v29  ;;  %v597_v22 = vmul.f32 %v1259_v8, %v1259_v8  ;;  %v1271_v35 = vsub.f32 %v1022_v41, %v568_v55  ;;  %v598_v36 = vmul.f32 %v1263_v12, %v1263_v12 }
 0x26b   :  { %v603_v6 = vadd.f32 %v602_v3, %v588_v2  ;;  %v599_v25 = vmul.f32 %v1267_v19, %v1267_v19 }
 0x26c   :  { %v600_v31 = vmul.f32 %v1271_v35, %v1271_v35 }
 0x26d   :  { %v604_v14 = vadd.f32 %v603_v6, %v589_v5 }
 0x26f   :  { %v605_v18 = vadd.f32 %v604_v14, %v590_v11 }
 0x271   :  { %v606_v23 = vadd.f32 %v605_v18, %v591_v17 }
 0x273   :  { %v607_v27 = vadd.f32 %v606_v23, %v592_v21 }
 0x275   :  { %v608_v30 = vadd.f32 %v607_v27, %v593_v26 }
 0x277   :  { %v609_v9 = vadd.f32 %v608_v30, %v594_v7 }
 0x279   :  { %v610_v16 = vadd.f32 %v609_v9, %v595_v32 }
 0x27b   :  { %v611_v33 = vadd.f32 %v610_v16, %v596_v13 }
 0x27d   :  { %v612_v39 = vadd.f32 %v611_v33, %v597_v22 }
 0x27f   :  { %v613_v28 = vadd.f32 %v612_v39, %v598_v36 }
 0x281   :  { %v614_v37 = vadd.f32 %v613_v28, %v599_v25 }
 0x283   :  { %v615_v34 = vadd.f32 %v614_v37, %v600_v31 }
 0x285   :  { %v616_v38 = vrot.slane %v615_v34, 4 }
 0x287   :  { %v617_v40 = vadd.f32 %v616_v38, %v615_v34 }
 0x289   :  { %v618_v42 = vrot.slane %v617_v40, 2 }
 0x28b   :  { %v619_v43 = vadd.f32 %v618_v42, %v617_v40 }
 0x28d   :  { %v620_v44 = vrot.slane %v619_v43, 1 }
 0x28f   :  { %v621_v41 = vadd.f32 %v620_v44, %v619_v43 }
 0x291   :  { %v622_v45 = vmul.f32 0.0078125, %v621_v41 }
 0x293   :  { %v624_v47 = vadd.f32 1e-05, %v622_v45 }
 0x295   :  { %1074 = vrsqrt.f32 %v624_v47  ;;  %v921_v47 = vld [vmem:[%s1367_s6] ss:$0 sm:$0xff] }
 0x2a2   :  { %v1075_v49 = vpop.eup %1074 }
 0x2a3   :  { %v626_v51 = vmul.f32 %v1075_v49, %v623_v48 }
 0x2a5   :  { %v630_v52 = vrot.slane %v626_v51, %v319_v1 }
 0x2a7   :  { %v631_v53 = vmul.f32 %v630_v52, %v569_v50  ;;  %v632_v55 = vmul.f32 %v630_v52, %v570_v57  ;;  %v633_v56 = vmul.f32 %v630_v52, %v571_v59  ;;  %v634_v61 = vmul.f32 %v630_v52, %v572_v62 }
 0x2a8   :  { %v635_v63 = vmul.f32 %v630_v52, %v573_v60  ;;  %v636_v54 = vmul.f32 %v630_v52, %v574_v58  ;;  %v637_v6 = vmul.f32 %v630_v52, %v575_v4  ;;  %v638_v18 = vmul.f32 %v630_v52, %v576_v10 }
 0x2a9   :  { %v652_v2 = vadd.f32 %v920_v46, %v631_v53  ;;  %v653_v3 = vadd.f32 %v920_v46, %v632_v55  ;;  %v654_v5 = vadd.f32 %v920_v46, %v633_v56  ;;  %v655_v11 = vadd.f32 %v920_v46, %v634_v61 }
 0x2aa   :  { %v656_v14 = vadd.f32 %v920_v46, %v635_v63  ;;  %v657_v17 = vadd.f32 %v920_v46, %v636_v54  ;;  %v639_v57 = vmul.f32 %v630_v52, %v1251_v15  ;;  %v640_v59 = vmul.f32 %v630_v52, %v578_v20 }
 0x2ab   :  { %v668_v0 = vmax.f32 %v652_v2, 0.0  ;;  %v669_v1 = vmax.f32 %v653_v3, 0.0  ;;  %v670_v21 = vmax.f32 %v654_v5, 0.0  ;;  %v671_v23 = vmax.f32 %v655_v11, 0.0 }
 0x2ac   :  { %v672_v26 = vmax.f32 %v656_v14, 0.0  ;;  %v673_v27 = vmax.f32 %v657_v17, 0.0  ;;  %v658_v60 = vadd.f32 %v920_v46, %v637_v6  ;;  %v659_v58 = vadd.f32 %v920_v46, %v638_v18 }
 0x2ad   :  { %v684_v50 = vpack.c.bf16 %v669_v1, %v668_v0  ;;  %v685_v62 = vpack.c.bf16 %v671_v23, %v670_v21  ;;  %v660_v4 = vadd.f32 %v920_v46, %v639_v57  ;;  %v661_v30 = vadd.f32 %v920_v46, %v640_v59 }
 0x2ae   :  { %v686_v7 = vpack.c.bf16 %v673_v27, %v672_v26  ;;  %v674_v10 = vmax.f32 %v658_v60, 0.0  ;;  %v675_v32 = vmax.f32 %v659_v58, 0.0  ;;  %v641_v9 = vmul.f32 %v630_v52, %v1253_v24 }
 0x2af   :  { %1039 = vmatprep.mubr.bf16.mxu0 %v684_v50  ;;  %v642_v13 = vmul.f32 %v630_v52, %v1257_v29  ;;  %v644_v16 = vmul.f32 %v630_v52, %v1263_v12  ;;  %v676_v22 = vmax.f32 %v660_v4, 0.0  ;;  %v677_v15 = vmax.f32 %v661_v30, 0.0 }
 0x2b0   :  { %1040 = vmatmul.mubr.bf16.vlgmr.msra.gmra.mxu0 %v685_v62  ;;  %v643_v20 = vmul.f32 %v630_v52, %v1259_v8  ;;  %v687_v33 = vpack.c.bf16 %v675_v32, %v674_v10  ;;  %v662_v36 = vadd.f32 %v920_v46, %v641_v9  ;;  %v645_v24 = vmul.f32 %v630_v52, %v1267_v19 }
 0x2b1   :  { %1043 = vmatprep.mubr.bf16.mxu0 %v686_v7  ;;  %v663_v39 = vadd.f32 %v920_v46, %v642_v13  ;;  %v665_v25 = vadd.f32 %v920_v46, %v644_v16  ;;  %v688_v28 = vpack.c.bf16 %v677_v15, %v676_v22  ;;  %v646_v29 = vmul.f32 %v630_v52, %v1271_v35 }
 0x2b2   :  { %v664_v31 = vadd.f32 %v920_v46, %v643_v20  ;;  %v678_v37 = vmax.f32 %v662_v36, 0.0  ;;  %v666_v42 = vadd.f32 %v920_v46, %v645_v24 }
 0x2b3   :  { %v679_v34 = vmax.f32 %v663_v39, 0.0  ;;  %v681_v38 = vmax.f32 %v665_v25, 0.0  ;;  %v667_v43 = vadd.f32 %v920_v46, %v646_v29 }
 0x2b4   :  { %v680_v12 = vmax.f32 %v664_v31, 0.0  ;;  %v682_v44 = vmax.f32 %v666_v42, 0.0 }
 0x2b5   :  { %v689_v40 = vpack.c.bf16 %v679_v34, %v678_v37  ;;  %v683_v41 = vmax.f32 %v667_v43, 0.0 }
 0x2b6   :  { %v690_v8 = vpack.c.bf16 %v681_v38, %v680_v12 }
 0x2b7   :  { %v691_v45 = vpack.c.bf16 %v683_v41, %v682_v44 }
 0x2b8   :  { %1044 = vmatmul.mubr.bf16.gmra.mxu0 %v687_v33 }
 0x2b9   :  { %1047 = vmatprep.mubr.bf16.mxu0 %v688_v28 }
 0x2c0   :  { %1048 = vmatmul.mubr.bf16.gmra.mxu0 %v689_v40 }
 0x2c1   :  { %1051 = vmatprep.mubr.bf16.mxu0 %v690_v8 }
 0x2c8   :  { %1052 = vmatmul.mubr.bf16.gmra.mxu0 %v691_v45 }
 0x370   :  { %v1041_v48 = vpop.f32.mrf.mxu0 }
 0x371   :  { %v806_v19 = vadd.f32 %v1041_v48, %v921_v47 }
 0x372   :  { %v797_v35 = vpop.f32.mrf.mxu0 }
 0x373   :  { %863 = vst.msk [vmem:[%s1368_s7 + $0x10] sm:$0xff] %vm860_vm1, %v806_v19  ;;  %v798_v49 = vadd.f32 %v921_v47, %v797_v35 }
 0x374   :  { %v1042_v51 = vpop.f32.mrf.mxu0 }
 0x375   :  { %861 = vst.msk [vmem:[%s1368_s7] sm:$0xff] %vm860_vm1, %v798_v49  ;;  %v809_v52 = vadd.f32 %v1042_v51, %v921_v47 }
 0x376   :  { %v800_v46 = vpop.f32.mrf.mxu0 }
 0x377   :  { %864 = vst.msk [vmem:[%s1368_s7 + $0x18] sm:$0xff] %vm860_vm1, %v809_v52  ;;  %v801_v53 = vadd.f32 %v921_v47, %v800_v46 }
 0x378   :  { %v1045_v55 = vpop.f32.mrf.mxu0 }
 0x379   :  { %862 = vst.msk [vmem:[%s1368_s7 + $0x8] sm:$0xff] %vm860_vm1, %v801_v53  ;;  %v822_v56 = vadd.f32 %v1045_v55, %v921_v47 }
 0x37a   :  { %v813_v61 = vpop.f32.mrf.mxu0 }
 0x37b   :  { %867 = vst.msk [vmem:[%s1368_s7 + $0x30] sm:$0xff] %vm860_vm1, %v822_v56  ;;  %v814_v63 = vadd.f32 %v921_v47, %v813_v61 }
 0x37c   :  { %v1046_v54 = vpop.f32.mrf.mxu0 }
 0x37d   :  { %865 = vst.msk [vmem:[%s1368_s7 + $0x20] sm:$0xff] %vm860_vm1, %v814_v63  ;;  %v825_v2 = vadd.f32 %v1046_v54, %v921_v47 }
 0x37e   :  { %v816_v3 = vpop.f32.mrf.mxu0 }
 0x37f   :  { %868 = vst.msk [vmem:[%s1368_s7 + $0x38] sm:$0xff] %vm860_vm1, %v825_v2  ;;  %v817_v5 = vadd.f32 %v921_v47, %v816_v3 }
 0x380   :  { %v1049_v6 = vpop.f32.mrf.mxu0 }
 0x381   :  { %866 = vst.msk [vmem:[%s1368_s7 + $0x28] sm:$0xff] %vm860_vm1, %v817_v5  ;;  %v838_v11 = vadd.f32 %v1049_v6, %v921_v47 }
 0x382   :  { %v829_v14 = vpop.f32.mrf.mxu0 }
 0x383   :  { %871 = vst.msk [vmem:[%s1368_s7 + $0x50] sm:$0xff] %vm860_vm1, %v838_v11  ;;  %v830_v17 = vadd.f32 %v921_v47, %v829_v14 }
 0x384   :  { %v1050_v18 = vpop.f32.mrf.mxu0 }
 0x385   :  { %869 = vst.msk [vmem:[%s1368_s7 + $0x40] sm:$0xff] %vm860_vm1, %v830_v17  ;;  %v841_v0 = vadd.f32 %v1050_v18, %v921_v47 }
 0x386   :  { %v832_v1 = vpop.f32.mrf.mxu0 }
 0x387   :  { %872 = vst.msk [vmem:[%s1368_s7 + $0x58] sm:$0xff] %vm860_vm1, %v841_v0  ;;  %v833_v21 = vadd.f32 %v921_v47, %v832_v1 }
 0x388   :  { %v1053_v23 = vpop.f32.mrf.mxu0 }
 0x389   :  { %870 = vst.msk [vmem:[%s1368_s7 + $0x48] sm:$0xff] %vm860_vm1, %v833_v21  ;;  %v854_v26 = vadd.f32 %v1053_v23, %v921_v47 }
 0x38a   :  { %v845_v27 = vpop.f32.mrf.mxu0 }
 0x38b   :  { %875 = vst.msk [vmem:[%s1368_s7 + $0x70] sm:$0xff] %vm860_vm1, %v854_v26  ;;  %v846_v50 = vadd.f32 %v921_v47, %v845_v27 }
 0x38c   :  { %v1054_v57 = vpop.f32.mrf.mxu0 }
 0x38d   :  { %873 = vst.msk [vmem:[%s1368_s7 + $0x60] sm:$0xff] %vm860_vm1, %v846_v50  ;;  %v857_v59 = vadd.f32 %v1054_v57, %v921_v47 }
 0x38e   :  { %v848_v62 = vpop.f32.mrf.mxu0 }
 0x38f   :  { %876 = vst.msk [vmem:[%s1368_s7 + $0x78] sm:$0xff] %vm860_vm1, %v857_v59  ;;  %v849_v60 = vadd.f32 %v921_v47, %v848_v62 }
 0x391   :  { %874 = vst.msk [vmem:[%s1368_s7 + $0x68] sm:$0xff] %vm860_vm1, %v849_v60 }
 0x392   :  { %881 = vsyncmov [#allocation3] }
 0x395   :  { %s882_s2 = vpop.sfrf %881 }
 0x396   :  { %p930_p0 = scmp.ne.s32.totalorder %s882_s2, 0 }
 0x398   :  { %886 = shalt.err (%p930_p0)  }
 0x399   :  { %888 = vsyncmov [#allocation3 + $0x1] }
 0x39c   :  { %s889_s0 = vpop.sfrf %888 }
 0x39d   :  { %p931_p1 = scmp.ne.s32.totalorder %s889_s0, 0 }
 0x39f   :  { %893 = shalt.err (%p931_p1)  }

</bundles_post_ra>
